<compile_context>
chip_gen: v7x
topology: tpu7x:2x2x1
jax: 0.10.0
libtpu: 0.0.40
codegen_flags: <defaults>
</compile_context>

<pallas_src>
import math

import jax
import jax.numpy as jnp
from jax.experimental import pallas as pl
from jax.experimental.pallas import tpu as pltpu


_WORLD_FOLD_MAX = 8   # fold world into the block up to this size
_LANE = 128


def _sublane_multiple(dtype):
    itemsize = jnp.dtype(dtype).itemsize
    return {4: 8, 2: 16, 1: 32}.get(itemsize, 8)


def _fold_allreduce_kernel(x_ref, y_ref, o_ref):
    """grid = (row_tiles,).  x_ref: (world, TR, LANES); y_ref/o_ref: (TR, LANES).

    Single pass: sum the world axis in f32 vregs, add y, cast, store once.
    """
    acc = jnp.sum(x_ref[...].astype(jnp.float32), axis=0)
    o_ref[...] = (acc + y_ref[...].astype(jnp.float32)).astype(o_ref.dtype)


def _grid_allreduce_kernel(x_ref, y_ref, o_ref, acc_ref):
    """grid = (row_tiles, world); world is the innermost (reduction) axis.

    Accumulates in an f32 VMEM scratch (precision-safe for bf16 inputs) and
    writes the output tile to HBM exactly once.
    """
    r = pl.program_id(1)

    @pl.when(r == 0)
    def _init():
        acc_ref[...] = x_ref[...].astype(jnp.float32) + y_ref[...].astype(jnp.float32)

    @pl.when(r > 0)
    def _accumulate():
        acc_ref[...] += x_ref[...].astype(jnp.float32)

    @pl.when(r == pl.num_programs(1) - 1)
    def _finalize():
        o_ref[...] = acc_ref[...].astype(o_ref.dtype)


def _choose_layout(total_elems, dtype, world, fold_world):
    """Pick a lane-dense 2-D layout, row tile, and padding.

    Returns (lanes, rows, pad_total, tile_rows, pad_rows).
    """
    itemsize = jnp.dtype(dtype).itemsize
    sub = _sublane_multiple(dtype)

    # Pad the flat length to a multiple of 128 lanes if needed (rare).
    pad_total = pl.cdiv(total_elems, _LANE) * _LANE

    # Widest lane count that still fills the sublane dimension (rows >= sub).
    lanes = _LANE
    for cand in (1024, 512, 256, 128):
        if pad_total % cand == 0 and pad_total // cand >= sub:
            lanes = cand
            break
    rows = pad_total // lanes

    # Target block size in bytes (~2-4 MiB); for the world-folded path keep the
    # whole (world, tr, lanes) x slab <= ~8 MiB so double-buffered VMEM stays
    # well under the v7x cap.
    if fold_world:
        max_tile_bytes = min(4 << 20, (8 << 20) // max(world, 1))
    else:
        max_tile_bytes = 4 << 20
    target_rows = max(sub, (max_tile_bytes // (lanes * itemsize)) // sub * sub)

    if rows <= target_rows:
        tile_rows, pad_rows = rows, rows
        # Give v7x's second TensorCore a tile when it splits cleanly.
        if rows >= 2 * sub and rows % (2 * sub) == 0:
            tile_rows = rows // 2
    else:
        # Largest multiple-of-sub divisor of rows that fits the byte target ->
        # no host-side padding in the common case.
        tile_rows = None
        for cand in range(int(target_rows), 0, -sub):
            if rows % cand == 0:
                tile_rows = cand
                break
        if tile_rows is None:
            tile_rows = int(target_rows)   # ragged: pad rows instead
        pad_rows = pl.cdiv(rows, tile_rows) * tile_rows

    return lanes, rows, pad_total, tile_rows, pad_rows


def allreduce_single_group(x_shards, y):
    """x_shards: [world, *shape]  (per-rank contributions)
       y       : [*shape]
       returns : [*shape]  == sum_over_world(x_shards) + y
    """
    world = x_shards.shape[0]
    out_nd_shape = y.shape
    dtype = x_shards.dtype
    itemsize = jnp.dtype(dtype).itemsize
    total = math.prod(out_nd_shape)

    fold_world = world <= _WORLD_FOLD_MAX
    lanes, rows, pad_total, tr, pad_rows = _choose_layout(total, dtype, world, fold_world)

    xf = x_shards.reshape(world, total)
    yf = y.reshape(total).astype(dtype)
    if pad_total != total:
        # TODO(synk): a masked tail store inside the kernel would avoid this host copy.
        xf = jnp.pad(xf, ((0, 0), (0, pad_total - total)))
        yf = jnp.pad(yf, (0, pad_total - total))

    x2d = xf.reshape(world, rows, lanes)
    y2d = yf.reshape(rows, lanes)
    if pad_rows != rows:
        x2d = jnp.pad(x2d, ((0, 0), (0, pad_rows - rows), (0, 0)))
        y2d = jnp.pad(y2d, ((0, pad_rows - rows), (0, 0)))

    n_row_tiles = pad_rows // tr
    tile_bytes = tr * lanes * itemsize

    cost = pl.CostEstimate(
        flops=world * pad_rows * lanes,              # world adds per element
        transcendentals=0,
        bytes_accessed=(world + 2) * pad_rows * lanes * itemsize,
    )

    if fold_world:
        kernel = _fold_allreduce_kernel
        grid_spec = pltpu.PrefetchScalarGridSpec(
            num_scalar_prefetch=0,
            grid=(n_row_tiles,),
            in_specs=[
                # whole world slab for this row tile, summed in-kernel
                pl.BlockSpec((world, tr, lanes), lambda i: (0, i, 0)),
                pl.BlockSpec((tr, lanes), lambda i: (i, 0)),
            ],
            out_specs=pl.BlockSpec((tr, lanes), lambda i: (i, 0)),
        )
        dim_sem = ("parallel",)
        vmem_est = (2 * world + 4) * tile_bytes          # x dbl-buf + y + out dbl-buf
    else:
        kernel = _grid_allreduce_kernel
        grid_spec = pltpu.PrefetchScalarGridSpec(
            num_scalar_prefetch=0,
            grid=(n_row_tiles, world),
            in_specs=[
                # one rank's row tile per world step; world axis squeezed away
                pl.BlockSpec((pl.Squeezed(), tr, lanes), lambda i, r: (r, i, 0)),
                pl.BlockSpec((tr, lanes), lambda i, r: (i, 0)),
            ],
            out_specs=pl.BlockSpec((tr, lanes), lambda i, r: (i, 0)),
            scratch_shapes=[pltpu.VMEM((tr, lanes), jnp.float32)],
        )
        dim_sem = ("parallel", "arbitrary")
        vmem_est = 6 * tile_bytes + tr * lanes * 4       # x/y/out dbl-buf + f32 scratch

    # Explicit VMEM bound with headroom; capped below v7x's 64 MiB physical VMEM.
    vmem_limit = int(min(max(2 * vmem_est + (4 << 20), 16 << 20), 48 << 20))

    out2d = pl.pallas_call(
        kernel,
        out_shape=jax.ShapeDtypeStruct((pad_rows, lanes), dtype),
        grid_spec=grid_spec,
        compiler_params=pltpu.CompilerParams(
            dimension_semantics=dim_sem,
            vmem_limit_bytes=vmem_limit,
        ),
        cost_estimate=cost,
    )(x2d, y2d)

    return out2d.reshape(-1)[:total].reshape(out_nd_shape)


if __name__ == "__main__":
    key = jax.random.PRNGKey(0)
    kx, ky, kx2 = jax.random.split(key, 3)

    # --- main case: small simulated world -> world-folded single-pass kernel ---
    WORLD = 4
    B, C, H, W = 2, 4, 16, 16
    x_shards = jax.random.normal(kx, (WORLD, B, C, H, W), dtype=jnp.float32)
    y = jax.random.normal(ky, (B, C, H, W), dtype=jnp.float32)

    ref = jax.block_until_ready(jnp.sum(x_shards, axis=0) + y)
    out = jax.block_until_ready(allreduce_single_group(x_shards, y))
    assert out.shape == (B, C, H, W)
    assert jnp.allclose(out, ref, atol=1e-5, rtol=1e-5), "mismatch vs reference (fold path)"

    # --- fallback case: large world -> grid-axis reduction with f32 scratch ---
    WORLD2 = 16
    x_shards2 = jax.random.normal(kx2, (WORLD2, B, C, H, W), dtype=jnp.float32)
    ref2 = jax.block_until_ready(jnp.sum(x_shards2, axis=0) + y)
    out2 = jax.block_until_ready(allreduce_single_group(x_shards2, y))
    assert jnp.allclose(out2, ref2, atol=1e-4, rtol=1e-5), "mismatch vs reference (grid path)"

    print("KERNEL_OK")
</pallas_src>

<mosaic_0001>
module attributes {stable_mosaic.version = 11 : i64} {
  func.func @_fold_allreduce_kernel(%arg0: i32, %arg1: memref<4x8x256xf32, #tpu.memory_space<vmem>>, %arg2: memref<8x256xf32, #tpu.memory_space<vmem>>, %arg3: memref<8x256xf32, #tpu.memory_space<vmem>>) attributes {dimension_semantics = [#tpu.dimension_semantics<parallel>], iteration_bounds = array<i64: 1>, scalar_prefetch = 0 : i64, scratch_operands = 0 : i64, tpu.core_type = #tpu.core_type<tc>, window_params = [{transform_indices = @transform_0, window_bounds = array<i64: 4, 8, 256>}, {transform_indices = @transform_1, window_bounds = array<i64: 8, 256>}, {transform_indices = @transform_2, window_bounds = array<i64: 8, 256>}]} {
    %c0 = arith.constant 0 : index
    %c0_0 = arith.constant 0 : index
    %c0_1 = arith.constant 0 : index
    %0 = vector.load %arg1[%c0, %c0_0, %c0_1] : memref<4x8x256xf32, #tpu.memory_space<vmem>>, vector<4x8x256xf32>
    %cst = arith.constant dense<0.000000e+00> : vector<8x256xf32>
    %1 = vector.multi_reduction <add>, %0, %cst [0] : vector<4x8x256xf32> to vector<8x256xf32>
    %c0_2 = arith.constant 0 : index
    %c0_3 = arith.constant 0 : index
    %2 = vector.load %arg2[%c0_2, %c0_3] : memref<8x256xf32, #tpu.memory_space<vmem>>, vector<8x256xf32>
    %3 = arith.addf %1, %2 : vector<8x256xf32>
    %c0_4 = arith.constant 0 : index
    %c0_5 = arith.constant 0 : index
    %4 = vector.load %arg3[%c0_4, %c0_5] : memref<8x256xf32, #tpu.memory_space<vmem>>, vector<8x256xf32>
    tpu.vector_store %arg3[%c0_4, %c0_5], %3 {strides = array<i32>} : memref<8x256xf32, #tpu.memory_space<vmem>>, vector<8x256xf32>,
    return
  }
  func.func @transform_0(%arg0: i32) -> (i32, i32, i32) {
    %c0_i32 = arith.constant 0 : i32
    %c0_i32_0 = arith.constant 0 : i32
    %c0_i32_1 = arith.constant 0 : i32
    return %c0_i32, %arg0, %c0_i32_0 : i32, i32, i32
  }
  func.func @transform_1(%arg0: i32) -> (i32, i32) {
    %c0_i32 = arith.constant 0 : i32
    %c0_i32_0 = arith.constant 0 : i32
    return %arg0, %c0_i32 : i32, i32
  }
  func.func @transform_2(%arg0: i32) -> (i32, i32) {
    %c0_i32 = arith.constant 0 : i32
    %c0_i32_0 = arith.constant 0 : i32
    return %arg0, %c0_i32 : i32, i32
  }
}

</mosaic_0001>

<bundles_post_ra>
// kernel: tpu_custom_call.1
= control target key start
LH: loop header
LB: loop body
LE: loop exit
PB: predicated region body
PF: predicated region fallthrough
CT: control target
= control target key end

     0   :  { %7 = vsyncpa [#allocation3], 0  ;;  %s207_s0 = inlined_call_operand.hbm [shape: f32[4,8,256], index: 0, kind: input, shape index: {}]   ;;  %s208_s1 = inlined_call_operand.hbm [shape: f32[8,256], index: 1, kind: input, shape index: {}]   ;;  %s209_s2 = inlined_call_operand.hbm [shape: f32[8,256], index: 2, kind: output, shape index: {}]  }
   0x1   :  { %8 = vsyncpa [#allocation6], 0 }
   0x2   :  { %9 = vsyncpa [#allocation4], 0  ;;  %s151_s9 = smov [#allocation2]   ;;  %s79_s13 = scalar_lea.hbm %s207_s0, 1024 }
   0x3   :  { %s15_s10 = sshll.u32 %s151_s9, 4  ;;  %p80_p0 = scmp.ne.s32.totalorder %s207_s0, %s79_s13  ;;  %s16_s10 = int_to_ptr.vmem [resolvable:$true] %s15_s10 }
   0x4   :  { %p83_p1 = scmp.lt.u32.totalorder %s79_s13, %s207_s0 }
   0x6   :  { %p85_p2 = pnand %p83_p1, %p80_p0 }
   0x8   :  { %88 = shalt.err (!%p85_p2)
}
   0x9   :  { %s89_s18 = scalar_lea.vmem %s16_s10, 1024  ;;  %p94_p4 = scmp.lt.s32.totalorder %s16_s10, %s16_s10 }
   0xa   :  { %p90_p3 = scmp.ne.s32.totalorder %s16_s10, %s89_s18  ;;  %p95_p5 = scmp.lt.s32.totalorder %s89_s18, %s89_s18 }
   0xc   :  { %p96_p6 = por %p95_p5, %p94_p4 }
   0xe   :  { %p97_p7 = pnand %p96_p6, %p90_p3 }
  0x10   :  { %100 = shalt.err (!%p97_p7)
}
  0x11   :  { %s152_s19 = smov 256   ;;  %s153_s20 = smov 16  }
  0x12   :  { %21 = dma.hbm_to_vmem [thread:$0]  %s207_s0, 1024, %s16_s10, [#allocation3], %s152_s19, %s152_s19, %s153_s20  }
  0x13   :  { %s154_s23 = smov [#allocation5]   ;;  %s101_s27 = scalar_lea.hbm %s208_s1, 256 }
  0x14   :  { %s28_s24 = sshll.u32 %s154_s23, 4  ;;  %p102_p8 = scmp.ne.s32.totalorder %s208_s1, %s101_s27  ;;  %s29_s24 = int_to_ptr.vmem [resolvable:$true] %s28_s24 }
  0x15   :  { %p105_p9 = scmp.lt.u32.totalorder %s101_s27, %s208_s1 }
  0x17   :  { %p107_p10 = pnand %p105_p9, %p102_p8 }
  0x19   :  { %110 = shalt.err (!%p107_p10)
}
  0x1a   :  { %s111_s4 = scalar_lea.vmem %s29_s24, 256  ;;  %p116_p12 = scmp.lt.s32.totalorder %s29_s24, %s29_s24 }
  0x1b   :  { %p112_p11 = scmp.ne.s32.totalorder %s29_s24, %s111_s4  ;;  %p117_p13 = scmp.lt.s32.totalorder %s111_s4, %s111_s4 }
  0x1d   :  { %p118_p0 = por %p117_p13, %p116_p12 }
  0x1f   :  { %p119_p1 = pnand %p118_p0, %p112_p11 }
  0x21   :  { %122 = shalt.err (!%p119_p1)
}
  0x22   :  { %31 = dma.hbm_to_vmem [thread:$0]  %s208_s1, 256, %s29_s24, [#allocation6]  }
  0x23   :  { %145 = dma.done.wait [#allocation3], 1024  }
  0x24   :  { %146 = vsyncadd [#allocation3], 4294966272 }
  0x25   :  { %147 = dma.done.wait [#allocation6], 256  }
  0x26   :  { %148 = vsyncadd [#allocation6], 4294967040  ;;  %v38_v0 = vld [vmem:[#allocation2] sm:$0xff]  ;;  %v40_v1 = vld [vmem:[#allocation2 + $0x10] sm:$0xff]  ;;  %s155_s1 = smov [#allocation7]  }
  0x27   :  { %v42_v2 = vld [vmem:[#allocation2 + $0x20] sm:$0xff]  ;;  %v46_v3 = vadd.f32 %v40_v1, %v38_v0  ;;  %v39_v4 = vld [vmem:[#allocation2 + $0x8] sm:$0xff]  ;;  %v44_v5 = vld [vmem:[#allocation2 + $0x30] sm:$0xff]  ;;  %s64_s6 = sshll.u32 %s155_s1, 4  ;;  %s65_s6 = int_to_ptr.vmem [resolvable:$true] %s64_s6 }
  0x28   :  { %v41_v6 = vld [vmem:[#allocation2 + $0x18] sm:$0xff]  ;;  %v43_v7 = vld [vmem:[#allocation2 + $0x28] sm:$0xff]  ;;  %v52_v10 = vld [vmem:[#allocation5] sm:$0xff]  ;;  %s123_s7 = scalar_lea.vmem %s65_s6, 256  ;;  %p128_p3 = scmp.lt.s32.totalorder %s65_s6, %s65_s6 }
  0x29   :  { %v47_v8 = vadd.f32 %v46_v3, %v42_v2  ;;  %v49_v9 = vadd.f32 %v41_v6, %v39_v4  ;;  %v45_v11 = vld [vmem:[#allocation2 + $0x38] sm:$0xff]  ;;  %v53_v14 = vld [vmem:[#allocation5 + $0x8] sm:$0xff]  ;;  %p124_p2 = scmp.ne.s32.totalorder %s65_s6, %s123_s7  ;;  %p129_p4 = scmp.lt.s32.totalorder %s123_s7, %s123_s7 }
  0x2b   :  { %v48_v12 = vadd.f32 %v47_v8, %v44_v5  ;;  %v50_v13 = vadd.f32 %v49_v9, %v43_v7  ;;  %p130_p5 = por %p129_p4, %p128_p3 }
  0x2d   :  { %v54_v15 = vadd.f32 %v52_v10, %v48_v12  ;;  %v51_v16 = vadd.f32 %v50_v13, %v45_v11  ;;  %p131_p6 = pnand %p130_p5, %p124_p2 }
  0x2f   :  { %56 = vst [vmem:[#allocation7] sm:$0xff] %v54_v15  ;;  %v55_v17 = vadd.f32 %v53_v14, %v51_v16 }
  0x31   :  { %57 = vst [vmem:[#allocation7 + $0x8] sm:$0xff] %v55_v17 }
  0x32   :  { %134 = shalt.err (!%p131_p6)
}
  0x33   :  { %s135_s10 = scalar_lea.hbm %s209_s2, 256 }
  0x34   :  { %p136_p7 = scmp.ne.s32.totalorder %s209_s2, %s135_s10  ;;  %p139_p8 = scmp.lt.u32.totalorder %s135_s10, %s209_s2 }
  0x36   :  { %p141_p9 = pnand %p139_p8, %p136_p7 }
  0x38   :  { %144 = shalt.err (!%p141_p9)
}
  0x39   :  { %67 = dma.vmem_to_hbm [thread:$0]  %s65_s6, 256, %s209_s2, [#allocation4]  }
  0x3a   :  { %149 = dma.done.wait [#allocation4], 256  }
  0x3b   :  { %150 = vsyncadd [#allocation4], 4294967040 }
  0x3c   :  { %71 = vsyncpa [#allocation3], 1 }
  0x3d   :  { %72 = vsyncpa [#allocation6], 1 }
  0x3e   :  { %73 = vsyncpa [#allocation4], 1 }

</bundles_post_ra>
